<compile_context>
chip_gen: v6e
topology: v6e:2x2x1
jax: 0.10.0
libtpu: 0.0.40
codegen_flags: <defaults>
</compile_context>

<pallas_src>
import functools

import numpy as np
import jax
import jax.numpy as jnp
from jax import lax
from jax.experimental import pallas as pl
from jax.experimental.pallas import tpu as pltpu


def _round_up(x, m):
    return ((x + m - 1) // m) * m


def _ladder_s21_kernel(params_ref, w_ref, out_ref, *, z0):
    # params_ref: (TB, 10) f32, w_ref: (1, TF) f32, out_ref: (TB, TF) f32
    TB = out_ref.shape[0]
    TF = out_ref.shape[1]
    n_strips = TB // 8

    # Hoisted once per grid step: the only divides on frequency-sized data.
    w = w_ref[0:1, :]                                   # (1, TF), already + 1e-30
    inv_w = 1.0 / w                                     # small (1, TF) divide
    wb = jnp.broadcast_to(w, (8, TF))                   # hoisted sublane broadcasts
    inv_wb = jnp.broadcast_to(inv_w, (8, TF))

    inv_z0 = np.float32(1.0 / z0)
    z0f = np.float32(z0)
    db2 = np.float32(20.0 * np.log10(2.0))              # 20*log10(2)

    def strip(s, carry):
        # One (8 x TF) sublane strip: 4 state planes stay in vregs for the whole cascade.
        r0 = pl.multiple_of(s * 8, 8)
        p = params_ref[pl.ds(r0, 8), :]                 # (8, 10)
        ip = 1.0 / p                                    # (8, 10) tiny divide

        # Reactance x_i (series) / susceptance y_i (shunt):
        #   x = w*L - 1/(w*C),  y = w*C - 1/(w*L)
        xy = []
        for i in range(5):
            Ci = p[:, 2 * i: 2 * i + 1]
            Li = p[:, 2 * i + 1: 2 * i + 2]
            iCi = ip[:, 2 * i: 2 * i + 1]
            iLi = ip[:, 2 * i + 1: 2 * i + 2]
            if i % 2 == 0:
                xy.append(wb * Li - inv_wb * iCi)       # series
            else:
                xy.append(wb * Ci - inv_wb * iLi)       # shunt
        x0, y1, x2, y3, x4 = xy

        # Lossless-ladder ABCD cascade with A,D real and B,C imaginary:
        #   series x:  bi += ar*x ; dr -= ci*x
        #   shunt  y:  ar -= bi*y ; ci += dr*y
        # starting from identity (ar=dr=1, bi=ci=0); first two sections folded by hand.
        ar = 1.0 - x0 * y1                              # after sections 0,1
        ci = y1
        bi = x0 + ar * x2                               # section 2 (series)
        dr = 1.0 - y1 * x2
        ar = ar - bi * y3                               # section 3 (shunt)
        ci = ci + dr * y3
        bi = bi + ar * x4                               # section 4 (series)
        dr = dr - ci * x4

        # denom = A + B/z0 + C*z0 + D = (ar+dr) + j*(bi/z0 + ci*z0); |S21| = 2/|denom|.
        den_re = ar + dr
        den_im = bi * inv_z0 + ci * z0f
        mag2 = den_re * den_re + den_im * den_im        # passive network => mag2 >= 4
        # 20*log10(2/sqrt(mag2) + 1e-30) == 20*log10(2) - 10*log10(mag2) for all finite
        # f32 mag2 (the 1e-30 guard is 11+ orders below the smallest reachable |S21|).
        out_ref[pl.ds(r0, 8), :] = db2 - 10.0 * jnp.log10(mag2)
        return carry

    lax.fori_loop(0, n_strips, strip, 0, unroll=(n_strips <= 8))


def ladder_s21(params, z0=50.0, n_pts=1000, f_max=5.0e9):
    """Pallas implementation of LadderS21.forward: (..., 10) -> (..., n_pts) float32 dB."""
    params = jnp.asarray(params, jnp.float32)
    if params.shape[-1] != 10:
        raise ValueError("params last dim must be 10")
    batch_shape = params.shape[:-1]
    B = int(np.prod(batch_shape)) if batch_shape else 1
    p2 = params.reshape(B, 10)

    # Frequency grid identical to the module; +1e-30 matches the PyTorch forward.
    f = jnp.linspace(1.0e8, f_max, n_pts, dtype=jnp.float32)
    w = (2.0 * np.pi * f + 1e-30).astype(jnp.float32).reshape(1, n_pts)

    # Tile sizes: TF lane-dense multiple of 128, TB a multiple of 8 (strips of 8 rows).
    TF = min(512, _round_up(n_pts, 128))
    Fp = _round_up(n_pts, TF)                           # 1000 -> 1024
    TB = min(128, _round_up(B, 8))
    Bp = _round_up(B, TB)

    # Pad: params rows with 1.0 (no 1/0), frequencies with the last (edge) value.
    p_pad = jnp.pad(p2, ((0, Bp - B), (0, 0)), constant_values=1.0)
    w_pad = jnp.pad(w, ((0, 0), (0, Fp - n_pts)), mode="edge")

    grid = (Bp // TB, Fp // TF)
    cost = pl.CostEstimate(
        flops=40 * Bp * Fp,                             # ~37 mul/add per element
        transcendentals=Bp * Fp,                        # one log per element
        bytes_accessed=4 * (Bp * Fp + Bp * 10 + Fp),
    )

    out = pl.pallas_call(
        functools.partial(_ladder_s21_kernel, z0=float(z0)),
        out_shape=jax.ShapeDtypeStruct((Bp, Fp), jnp.float32),
        grid=grid,
        in_specs=[
            pl.BlockSpec((TB, 10), lambda i, j: (i, 0)),   # last dim = full array dim
            pl.BlockSpec((1, TF), lambda i, j: (0, j)),
        ],
        out_specs=pl.BlockSpec((TB, TF), lambda i, j: (i, j)),
        compiler_params=pltpu.CompilerParams(
            dimension_semantics=("parallel", "parallel")),
        cost_estimate=cost,
    )(p_pad, w_pad)

    out = out[:B, :n_pts]
    return out.reshape(*batch_shape, n_pts)


def ladder_s21_ref(params, z0=50.0, n_pts=1000, f_max=5.0e9):
    """Pure-JAX reference mirroring the PyTorch forward (complex64)."""
    params = jnp.asarray(params, jnp.float32)
    C = params[..., 0::2]
    L = params[..., 1::2]
    batch_shape = params.shape[:-1]
    f = jnp.linspace(1.0e8, f_max, n_pts, dtype=jnp.float32)
    w = (2.0 * np.pi * f + 1e-30).reshape((1,) * len(batch_shape) + (n_pts,))
    abcd = jnp.broadcast_to(jnp.eye(2, dtype=jnp.complex64),
                            batch_shape + (n_pts, 2, 2))
    for i in range(5):
        Ci = C[..., i][..., None]
        Li = L[..., i][..., None]
        Zs = 1j * w * Li + 1.0 / (1j * w * Ci)
        Yp = 1j * w * Ci + 1.0 / (1j * w * Li)
        elem = jnp.zeros(batch_shape + (n_pts, 2, 2), jnp.complex64)
        elem = elem.at[..., 0, 0].set(1.0)
        elem = elem.at[..., 1, 1].set(1.0)
        if i % 2 == 0:
            elem = elem.at[..., 0, 1].set(Zs)
        else:
            elem = elem.at[..., 1, 0].set(Yp)
        abcd = jnp.matmul(abcd, elem)
    a = abcd[..., 0, 0]
    b = abcd[..., 0, 1]
    c = abcd[..., 1, 0]
    d = abcd[..., 1, 1]
    denom = a + b / z0 + c * z0 + d
    s21 = 2.0 / denom
    return 20.0 * jnp.log10(jnp.abs(s21) + 1e-30)


if __name__ == "__main__":
    key = jax.random.PRNGKey(0)
    kc, kl = jax.random.split(key)
    batch_shape = (2, 4)
    # Physically plausible component values: C in 1..10 pF, L in 1..10 nH.
    C = jax.random.uniform(kc, batch_shape + (5,), jnp.float32, 1e-12, 1e-11)
    L = jax.random.uniform(kl, batch_shape + (5,), jnp.float32, 1e-9, 1e-8)
    params = jnp.stack([C, L], axis=-1).reshape(*batch_shape, 10)  # [C1,L1,...,C5,L5]

    out = ladder_s21(params)
    out = jax.block_until_ready(out)

    ref = jax.block_until_ready(ladder_s21_ref(params))
    assert out.shape == batch_shape + (1000,), out.shape
    np.testing.assert_allclose(np.asarray(out), np.asarray(ref), rtol=2e-3, atol=2e-3)

    print("KERNEL_OK")
</pallas_src>

<mosaic_0001>
module attributes {stable_mosaic.version = 11 : i64} {
  func.func @_ladder_s21_kernel(%arg0: i32, %arg1: i32, %arg2: memref<8x10xf32, #tpu.memory_space<vmem>>, %arg3: memref<1x512xf32, #tpu.memory_space<vmem>>, %arg4: memref<8x512xf32, #tpu.memory_space<vmem>>) attributes {dimension_semantics = [#tpu.dimension_semantics<parallel>, #tpu.dimension_semantics<parallel>], iteration_bounds = array<i64: 1, 2>, scalar_prefetch = 0 : i64, scratch_operands = 0 : i64, tpu.core_type = #tpu.core_type<tc>, window_params = [{transform_indices = @transform_0, window_bounds = array<i64: 8, 10>}, {transform_indices = @transform_1, window_bounds = array<i64: 1, 512>}, {transform_indices = @transform_2, window_bounds = array<i64: 8, 512>}]} {
    %c0 = arith.constant 0 : index
    %c0_0 = arith.constant 0 : index
    %0 = vector.load %arg3[%c0, %c0_0] : memref<1x512xf32, #tpu.memory_space<vmem>>, vector<1x512xf32>
    %cst = arith.constant 1.000000e+00 : f32
    %1 = vector.broadcast %cst : f32 to vector<1x512xf32>
    %2 = arith.divf %1, %0 : vector<1x512xf32>
    %3 = vector.shape_cast %0 : vector<1x512xf32> to vector<1x512xf32>
    %4 = vector.broadcast %3 : vector<1x512xf32> to vector<8x512xf32>
    %5 = vector.shape_cast %2 : vector<1x512xf32> to vector<1x512xf32>
    %6 = vector.broadcast %5 : vector<1x512xf32> to vector<8x512xf32>
    %c0_i32 = arith.constant 0 : i32
    %c8_i32 = arith.constant 8 : i32
    %7 = arith.muli %c0_i32, %c8_i32 : i32
    %8 = tpu.assume_multiple %7, 8 : i32
    %9 = arith.index_cast %8 : i32 to index
    %c0_1 = arith.constant 0 : index
    %10 = vector.load %arg2[%9, %c0_1] : memref<8x10xf32, #tpu.memory_space<vmem>>, vector<8x10xf32>
    %cst_2 = arith.constant 1.000000e+00 : f32
    %11 = vector.broadcast %cst_2 : f32 to vector<8x10xf32>
    %12 = arith.divf %11, %10 : vector<8x10xf32>
    %13 = vector.extract_strided_slice %10 {offsets = [0, 1], sizes = [8, 1], strides = [1, 1]} : vector<8x10xf32> to vector<8x1xf32>
    %14 = vector.extract_strided_slice %12 {offsets = [0, 0], sizes = [8, 1], strides = [1, 1]} : vector<8x10xf32> to vector<8x1xf32>
    %15 = vector.broadcast %13 : vector<8x1xf32> to vector<8x512xf32>
    %16 = arith.mulf %4, %15 : vector<8x512xf32>
    %17 = vector.broadcast %14 : vector<8x1xf32> to vector<8x512xf32>
    %18 = arith.mulf %6, %17 : vector<8x512xf32>
    %19 = arith.subf %16, %18 : vector<8x512xf32>
    %20 = vector.extract_strided_slice %10 {offsets = [0, 2], sizes = [8, 1], strides = [1, 1]} : vector<8x10xf32> to vector<8x1xf32>
    %21 = vector.extract_strided_slice %12 {offsets = [0, 3], sizes = [8, 1], strides = [1, 1]} : vector<8x10xf32> to vector<8x1xf32>
    %22 = vector.broadcast %20 : vector<8x1xf32> to vector<8x512xf32>
    %23 = arith.mulf %4, %22 : vector<8x512xf32>
    %24 = vector.broadcast %21 : vector<8x1xf32> to vector<8x512xf32>
    %25 = arith.mulf %6, %24 : vector<8x512xf32>
    %26 = arith.subf %23, %25 : vector<8x512xf32>
    %27 = vector.extract_strided_slice %10 {offsets = [0, 5], sizes = [8, 1], strides = [1, 1]} : vector<8x10xf32> to vector<8x1xf32>
    %28 = vector.extract_strided_slice %12 {offsets = [0, 4], sizes = [8, 1], strides = [1, 1]} : vector<8x10xf32> to vector<8x1xf32>
    %29 = vector.broadcast %27 : vector<8x1xf32> to vector<8x512xf32>
    %30 = arith.mulf %4, %29 : vector<8x512xf32>
    %31 = vector.broadcast %28 : vector<8x1xf32> to vector<8x512xf32>
    %32 = arith.mulf %6, %31 : vector<8x512xf32>
    %33 = arith.subf %30, %32 : vector<8x512xf32>
    %34 = vector.extract_strided_slice %10 {offsets = [0, 6], sizes = [8, 1], strides = [1, 1]} : vector<8x10xf32> to vector<8x1xf32>
    %35 = vector.extract_strided_slice %12 {offsets = [0, 7], sizes = [8, 1], strides = [1, 1]} : vector<8x10xf32> to vector<8x1xf32>
    %36 = vector.broadcast %34 : vector<8x1xf32> to vector<8x512xf32>
    %37 = arith.mulf %4, %36 : vector<8x512xf32>
    %38 = vector.broadcast %35 : vector<8x1xf32> to vector<8x512xf32>
    %39 = arith.mulf %6, %38 : vector<8x512xf32>
    %40 = arith.subf %37, %39 : vector<8x512xf32>
    %41 = vector.extract_strided_slice %10 {offsets = [0, 9], sizes = [8, 1], strides = [1, 1]} : vector<8x10xf32> to vector<8x1xf32>
    %42 = vector.extract_strided_slice %12 {offsets = [0, 8], sizes = [8, 1], strides = [1, 1]} : vector<8x10xf32> to vector<8x1xf32>
    %43 = vector.broadcast %41 : vector<8x1xf32> to vector<8x512xf32>
    %44 = arith.mulf %4, %43 : vector<8x512xf32>
    %45 = vector.broadcast %42 : vector<8x1xf32> to vector<8x512xf32>
    %46 = arith.mulf %6, %45 : vector<8x512xf32>
    %47 = arith.subf %44, %46 : vector<8x512xf32>
    %48 = arith.mulf %19, %26 : vector<8x512xf32>
    %cst_3 = arith.constant 1.000000e+00 : f32
    %49 = vector.broadcast %cst_3 : f32 to vector<8x512xf32>
    %50 = arith.subf %49, %48 : vector<8x512xf32>
    %51 = arith.mulf %50, %33 : vector<8x512xf32>
    %52 = arith.addf %19, %51 : vector<8x512xf32>
    %53 = arith.mulf %26, %33 : vector<8x512xf32>
    %cst_4 = arith.constant 1.000000e+00 : f32
    %54 = vector.broadcast %cst_4 : f32 to vector<8x512xf32>
    %55 = arith.subf %54, %53 : vector<8x512xf32>
    %56 = arith.mulf %52, %40 : vector<8x512xf32>
    %57 = arith.subf %50, %56 : vector<8x512xf32>
    %58 = arith.mulf %55, %40 : vector<8x512xf32>
    %59 = arith.addf %26, %58 : vector<8x512xf32>
    %60 = arith.mulf %57, %47 : vector<8x512xf32>
    %61 = arith.addf %52, %60 : vector<8x512xf32>
    %62 = arith.mulf %59, %47 : vector<8x512xf32>
    %63 = arith.subf %55, %62 : vector<8x512xf32>
    %64 = arith.addf %57, %63 : vector<8x512xf32>
    %cst_5 = arith.constant 2.000000e-02 : f32
    %65 = vector.broadcast %cst_5 : f32 to vector<8x512xf32>
    %66 = arith.mulf %61, %65 : vector<8x512xf32>
    %cst_6 = arith.constant 5.000000e+01 : f32
    %67 = vector.broadcast %cst_6 : f32 to vector<8x512xf32>
    %68 = arith.mulf %59, %67 : vector<8x512xf32>
    %69 = arith.addf %66, %68 : vector<8x512xf32>
    %70 = arith.mulf %64, %64 : vector<8x512xf32>
    %71 = arith.mulf %69, %69 : vector<8x512xf32>
    %72 = arith.addf %70, %71 : vector<8x512xf32>
    %73 = math.log %72 : vector<8x512xf32>
    %cst_7 = arith.constant 0.434294492 : f32
    %74 = vector.broadcast %cst_7 : f32 to vector<8x512xf32>
    %75 = arith.mulf %73, %74 : vector<8x512xf32>
    %cst_8 = arith.constant 1.000000e+01 : f32
    %76 = vector.broadcast %cst_8 : f32 to vector<8x512xf32>
    %77 = arith.mulf %76, %75 : vector<8x512xf32>
    %cst_9 = arith.constant 6.020600e+00 : f32
    %78 = vector.broadcast %cst_9 : f32 to vector<8x512xf32>
    %79 = arith.subf %78, %77 : vector<8x512xf32>
    %80 = arith.index_cast %8 : i32 to index
    %c0_10 = arith.constant 0 : index
    %81 = vector.load %arg4[%80, %c0_10] : memref<8x512xf32, #tpu.memory_space<vmem>>, vector<8x512xf32>
    tpu.vector_store %arg4[%80, %c0_10], %79 {strides = array<i32>} : memref<8x512xf32, #tpu.memory_space<vmem>>, vector<8x512xf32>,
    %c1_i32 = arith.constant 1 : i32
    return
  }
  func.func @transform_0(%arg0: i32, %arg1: i32) -> (i32, i32) {
    %c0_i32 = arith.constant 0 : i32
    %c0_i32_0 = arith.constant 0 : i32
    return %arg0, %c0_i32 : i32, i32
  }
  func.func @transform_1(%arg0: i32, %arg1: i32) -> (i32, i32) {
    %c0_i32 = arith.constant 0 : i32
    %c0_i32_0 = arith.constant 0 : i32
    return %c0_i32, %arg1 : i32, i32
  }
  func.func @transform_2(%arg0: i32, %arg1: i32) -> (i32, i32) {
    %c0_i32 = arith.constant 0 : i32
    return %arg0, %arg1 : i32, i32
  }
}

</mosaic_0001>

<bundles_post_ra>
// kernel: tpu_custom_call.1
= control target key start
LH: loop header
LB: loop body
LE: loop exit
PB: predicated region body
PF: predicated region fallthrough
CT: control target
= control target key end

     0   :  { %7 = vsyncpa [#allocation3], 0  ;;  %s1121_s0 = inlined_call_operand.hbm [shape: f32[8,10], index: 0, kind: input, shape index: {}]   ;;  %s1122_s1 = inlined_call_operand.hbm [shape: f32[1,1024], index: 1, kind: input, shape index: {}]   ;;  %s1123_s2 = inlined_call_operand.hbm [shape: f32[8,1024], index: 2, kind: output, shape index: {}]  }
   0x1   :  { %8 = vsyncpa [#allocation6], 0 }
   0x2   :  { %10 = vsyncpa [#allocation6 + $0x1], 0 }
   0x3   :  { %11 = vsyncpa [#allocation4], 0 }
   0x4   :  { %13 = vsyncpa [#allocation4 + $0x1], 0  ;;  %s862_s9 = smov 0   ;;  %s864_s10 = smov 0  }
   0x5   :  { %s866_s11 = smov 0   ;;  %s868_s12 = smov 0  }
   0x6   :  { %s870_s13 = smov 0   ;;  %s872_s14 = smov 0  }
   0x7 LB: > { %s569_s15 = sadd.s32 4294967295, %s832_s14   ;;  %s570_s16 = sadd.s32 4294967294, %s832_s14   ;;  %s832_s14 = sphi %s872_s14, %s19_s14   ;;  %s828_s13 = sphi %s870_s13, %s1140_s13   ;;  %s824_s12 = sphi %s868_s12, %s1139_s12   ;;  %s820_s11 = sphi %s866_s11, %s1138_s11   ;;  %s816_s10 = sphi %s864_s10, %s1137_s10   ;;  %s812_s9 = sphi %s862_s9, %s1136_s9  }
   0x8   : > { %p77_p0 = scmp.ne.s32.totalorder %s816_s10, %s812_s9  ;;  %p896_p1 = scmp.eq.s32.totalorder %s569_s15, 0 }
   0x9   : > { %p900_p2 = scmp.eq.s32.totalorder %s569_s15, 1  ;;  %p109_p3 = scmp.eq.s32.totalorder %s570_s16, 1 }
   0xa   : > { %p906_p4 = por %p896_p1, %p77_p0  ;;  %p571_p5 = scmp.ge.s32.totalorder %s832_s14, 1 }
   0xb   : > { %p911_p6 = por %p109_p3, %p77_p0  ;;  %p116_p7 = scmp.lt.s32.totalorder %s832_s14, 3 }
   0xc   : > { %s1127_s19 = scalar_select %p906_p4, 1, 0 }
   0xd   : > { %s1128_s20 = scalar_select %p911_p6, 1, 0 }
   0xe   : > { %p916_p8 = pnand %p571_p5, %p116_p7  ;;  %s834_s22 = smov [#allocation2]  }
   0xf   : > { %s131_s23 = sshll.u32 %s834_s22, 4  ;;  %s28_s25 = sadd.s32 1, %s828_s13  ;;  %s132_s23 = int_to_ptr.vmem [resolvable:$true] %s131_s23 }
  0x10   : > { %p596_p10 = pneg %p916_p8  ;;  %s64_s26 = sadd.s32 1, %s820_s11 }
  0x11   : > { %p29_p12 = scmp.ge.s32.totalorder %s28_s25, 2  ;;  %s705_s27 = scalar_lea.vmem %s132_s23, 128 }
  0x12   : > { %p925_p11 = pnand %p596_p10, %p896_p1  ;;  %p706_p0 = scmp.ne.s32.totalorder %s132_s23, %s705_s27 }
  0x13   : > { %p713_p7 = scmp.lt.s32.totalorder %s132_s23, %s132_s23  ;;  %p714_p6 = scmp.lt.s32.totalorder %s705_s27, %s705_s27 }
  0x14   : > { %p696_p13 = pneg %p925_p11 }
  0x15   : > { %p715_p9 = por %p714_p6, %p713_p7 }
  0x16   : > { %p708_p3 = pnand %p706_p0, %p696_p13 }
  0x18   : > { %p709_p5 = pneg %p708_p3 }
  0x1a   : > { %p716_p4 = pnand %p715_p9, %p709_p5 }
  0x1c   : > { %719 = shalt.err (!%p716_p4)
}
  0x1d   : > { %599 = dma.hbm_to_vmem [thread:$0]  (!%p925_p11), %s1121_s0, 128, %s132_s23, [#allocation3]  }
  0x1e   : > { %s1142_s25 = smov (%p29_p12, %s28_s25), 0  ;;  %p71_p6 = scmp.ne.s32.totalorder %s820_s11, %s816_s10 }
  0x1f   : > { %p72_p4 = scmp.eq.s32.totalorder %s832_s14, 0  ;;  %s61_s30 = ssub.s32 %s828_s13, %s1142_s25 }
  0x20   : > { %p609_p9 = scmp.lt.s32.totalorder %s832_s14, 2  ;;  %p62_p10 = scmp.eq.s32.totalorder %s61_s30, 0 }
  0x21   : > { %p73_p13 = por %p72_p4, %p71_p6  ;;  %p948_p0 = por %p900_p2, %p71_p6 }
  0x22   : > { %s142_s4 = sand.u32 1, %s820_s11   ;;  %s586_s7 = sshll.u32 %s828_s13, 6 }
  0x23   : > { %s954_s5 = scalar_select %p62_p10, %s820_s11, %s64_s26  }
  0x24   : > { %s574_s6 = sshll.u32 %s142_s4, 2  ;;  %s152_s16 = scalar_lea.hbm %s1122_s1, %s586_s7 }
  0x25   : > { %s146_s22 = scalar_lea.vmem [#allocation5], %s574_s6  ;;  %p960_p11 = pnand %p609_p9, %p73_p13 }
  0x26   : > { %s154_s23 = sshll.u32 %s146_s22, 4  ;;  %s143_s18 = scalar_lea.sflag [#allocation6], %s142_s4  ;;  %s155_s23 = int_to_ptr.vmem [resolvable:$true] %s154_s23 }
  0x27   : > { %p722_p2 = pneg %p960_p11  ;;  %s733_s27 = scalar_lea.vmem %s155_s23, 64 }
  0x28   : > { %p734_p12 = scmp.ne.s32.totalorder %s155_s23, %s733_s27  ;;  %s835_s26 = smov [#allocation5]  }
  0x29   : > { %s738_s28 = sshll.u32 %s835_s26, 4  ;;  %s739_s28 = int_to_ptr.vmem [resolvable:$false] %s738_s28 }
  0x2a   : > { %p736_p3 = pnand %p734_p12, %p722_p2  ;;  %s740_s29 = scalar_lea.vmem %s739_s28, 128 }
  0x2b   : > { %p741_p7 = scmp.lt.s32.totalorder %s155_s23, %s739_s28  ;;  %p742_p6 = scmp.lt.s32.totalorder %s740_s29, %s733_s27 }
  0x2c   : > { %p737_p5 = pneg %p736_p3 }
  0x2d   : > { %p743_p4 = por %p742_p6, %p741_p7 }
  0x2f   : > { %p744_p10 = pnand %p743_p4, %p737_p5 }
  0x31   : > { %747 = shalt.err (!%p744_p10)
}
  0x32   : > { %603 = dma.hbm_to_vmem [thread:$0]  (!%p960_p11), %s152_s16, 64, %s155_s23, %s143_s18  }
  0x33   : > { %163 = sbr.rel (%p916_p8) target bundleno = 275 (0x113), region = 28 }
  0x38   : > { %799 = dma.done.wait (%p896_p1), [#allocation3], 128  }
  0x39   : > { %801 = vsyncadd (%p896_p1), [#allocation3], 4294967168  ;;  %s975_s30 = sand.u32 1, %s816_s10   ;;  %p1133_p9 = scmp.ne.s32.totalorder %s1127_s19, 0 }
  0x3a   : > { %s579_s4 = sshll.u32 %s975_s30, 2  ;;  %s170_s6 = scalar_lea.sflag [#allocation6], %s975_s30 }
  0x3b   : > { %s979_s7 = scalar_lea.vmem [#allocation5], %s579_s4 }
  0x3c   : > { %803 = dma.done.wait (%p1133_p9), %s170_s6, 64  }
  0x3d   : > { %805 = vsyncadd (%p1133_p9), %s170_s6, 4294967232  ;;  %v836_v0 = vmov 2   ;;  %v837_v1 = vmov 1   ;;  %v241_v2 = vld [vmem:[#allocation2] sm:$0xff]  ;;  %v838_v3 = vmov 5   ;;  %v839_v4 = vmov 0  }
  0x3e   : > { %672 = vset.pattern.permute.xlu1 %v836_v0  ;;  %671 = vset.pattern.permute.xlu0 %v837_v1  ;;  %682 = vrcp.f32 %v241_v2  ;;  %v840_v5 = vmov 3   ;;  %v841_v7 = vmov 6   ;;  %v842_v8 = vmov 4   ;;  %v196_v12 = vld [vmem:[%s979_s7] sm:$0xf]  ;;  %s580_s17 = sshll.u32 %s975_s30, 5 }
  0x3f   : > { %267 = vperm.xlu1 %672, %v241_v2   ;;  %246 = vperm.xlu0 %671, %v241_v2   ;;  %v843_v9 = vmov 7   ;;  %v844_v10 = vmov 9   ;;  %v845_v11 = vmov 8   ;;  %684 = vrcp.f32 %v196_v12  ;;  %s587_s19 = sshll.u32 %s824_s12, 9  ;;  %s193_s21 = scalar_lea.vmem [#allocation7], %s580_s17 }
  0x40   : > { %v200_v13 = vlaneseq  ;;  %s474_s8 = sshll.u32 %s193_s21, 4  ;;  %s1079_s22 = scalar_lea.hbm %s1123_s2, %s587_s19  ;;  %s475_s8 = int_to_ptr.vmem [resolvable:$true] %s474_s8 }
  0x41   : > { %s458_s23 = scalar_lea.sflag [#allocation4], %s975_s30  ;;  %s748_s24 = scalar_lea.vmem %s475_s8, 512 }
  0x42   : > { %v201_v14 = vshrl.u32 %v200_v13, 7  ;;  %p749_p1 = scmp.ne.s32.totalorder %s475_s8, %s748_s24  ;;  %s846_s12 = smov [#allocation7]  }
  0x43   : > { %673 = vset.pattern.permute.xlu1 %v838_v3  ;;  %674 = vset.pattern.permute.xlu0 %v839_v4  ;;  %s752_s18 = sshll.u32 %s846_s12, 4  ;;  %s753_s18 = int_to_ptr.vmem [resolvable:$false] %s752_s18 }
  0x44   : > { %287 = vperm.xlu1 %673, %v241_v2   ;;  %v202_v16 = vsub.s32 0, %v201_v14  ;;  %v206_v17 = vsub.s32 1, %v201_v14  ;;  %v210_v18 = vsub.s32 2, %v201_v14  ;;  %v214_v19 = vsub.s32 3, %v201_v14  ;;  %p750_p8 = pnand %p749_p1, %p948_p0  ;;  %s754_s27 = scalar_lea.vmem %s753_s18, 1024 }
  0x45   : > { %p755_p11 = scmp.lt.s32.totalorder %s475_s8, %s753_s18  ;;  %p756_p2 = scmp.lt.s32.totalorder %s754_s27, %s748_s24 }
  0x46   : > { %v986_v23 = vrot.slane %v196_v12, %v202_v16  ;;  %v988_v24 = vrot.slane %v196_v12, %v206_v17  ;;  %v990_v25 = vrot.slane %v196_v12, %v210_v18  ;;  %v992_v26 = vrot.slane %v196_v12, %v214_v19  ;;  %p751_p13 = pneg %p750_p8 }
  0x47   : > { %p757_p12 = por %p756_p2, %p755_p11 }
  0x48   : > { %675 = vset.pattern.permute.xlu1 %v840_v5 }
  0x49   : > { %p758_p3 = pnand %p757_p12, %p751_p13 }
  0x4b   : > { %v683_v6 = vpop.eup %682 }
  0x4c   : > { %275 = vperm.xlu1 %675, %v683_v6   ;;  %255 = vperm.xlu0 %674, %v683_v6   ;;  %v685_v20 = vpop.eup %684 }
  0x4d   : > { %v994_v27 = vrot.slane %v685_v20, %v202_v16  ;;  %v996_v28 = vrot.slane %v685_v20, %v206_v17  ;;  %v998_v29 = vrot.slane %v685_v20, %v210_v18  ;;  %v1000_v30 = vrot.slane %v685_v20, %v214_v19 }
  0x50   : > { %676 = vset.pattern.permute.xlu1 %v841_v7  ;;  %677 = vset.pattern.permute.xlu0 %v842_v8 }
  0x51   : > { %307 = vperm.xlu1 %676, %v241_v2   ;;  %295 = vperm.xlu0 %677, %v683_v6  }
  0x55   : > { %678 = vset.pattern.permute.xlu1 %v843_v9  ;;  %679 = vset.pattern.permute.xlu0 %v844_v10 }
  0x56   : > { %315 = vperm.xlu1 %678, %v683_v6   ;;  %327 = vperm.xlu0 %679, %v241_v2  }
  0x5a   : > { %680 = vset.pattern.permute.xlu1 %v845_v11  ;;  %681 = vset.pattern.permute.xlu0 %v845_v11 }
  0x5b   : > { %335 = vperm.xlu1 %680, %v683_v6  }
  0xba   : > { %v268_v15 = vpop.permute.xlu1 %267  ;;  %v247_v22 = vpop.permute.xlu0 %246 }
  0xbb   : > { %v270_v31 = vmul.f32 %v268_v15, %v986_v23  ;;  %v271_v32 = vmul.f32 %v268_v15, %v988_v24  ;;  %v272_v33 = vmul.f32 %v268_v15, %v990_v25  ;;  %v273_v34 = vmul.f32 %v268_v15, %v992_v26 }
  0xbc   : > { %v249_v35 = vmul.f32 %v247_v22, %v986_v23  ;;  %v250_v36 = vmul.f32 %v247_v22, %v988_v24  ;;  %v251_v37 = vmul.f32 %v247_v22, %v990_v25  ;;  %v252_v38 = vmul.f32 %v247_v22, %v992_v26 }
  0xbf   : > { %v288_v21 = vpop.permute.xlu1 %287 }
  0xc0   : > { %v290_v63 = vmul.f32 %v288_v21, %v986_v23  ;;  %v291_v0 = vmul.f32 %v288_v21, %v988_v24  ;;  %v292_v1 = vmul.f32 %v288_v21, %v990_v25  ;;  %v293_v2 = vmul.f32 %v288_v21, %v992_v26 }
  0xc7   : > { %v276_v39 = vpop.permute.xlu1 %275  ;;  %v256_v40 = vpop.permute.xlu0 %255 }
  0xc8   : > { %v278_v41 = vmul.f32 %v276_v39, %v994_v27  ;;  %v279_v42 = vmul.f32 %v276_v39, %v996_v28  ;;  %v280_v43 = vmul.f32 %v276_v39, %v998_v29  ;;  %v281_v44 = vmul.f32 %v276_v39, %v1000_v30 }
  0xc9   : > { %v258_v45 = vmul.f32 %v256_v40, %v994_v27  ;;  %v259_v46 = vmul.f32 %v256_v40, %v996_v28  ;;  %v260_v47 = vmul.f32 %v256_v40, %v998_v29  ;;  %v261_v48 = vmul.f32 %v256_v40, %v1000_v30 }
  0xca   : > { %v1018_v49 = vsub.f32 %v270_v31, %v278_v41  ;;  %v1020_v50 = vsub.f32 %v271_v32, %v279_v42  ;;  %v1022_v51 = vsub.f32 %v272_v33, %v280_v43  ;;  %v1024_v52 = vsub.f32 %v273_v34, %v281_v44 }
  0xcb   : > { %v262_v53 = vsub.f32 %v249_v35, %v258_v45  ;;  %v263_v54 = vsub.f32 %v250_v36, %v259_v46  ;;  %v264_v55 = vsub.f32 %v251_v37, %v260_v47  ;;  %v265_v56 = vsub.f32 %v252_v38, %v261_v48 }
  0xcc   : > { %v308_v57 = vpop.permute.xlu1 %307  ;;  %v296_v62 = vpop.permute.xlu0 %295 }
  0xcd   : > { %v1027_v58 = vmul.f32 %v1018_v49, %v262_v53  ;;  %v1030_v59 = vmul.f32 %v1020_v50, %v263_v54  ;;  %v1033_v60 = vmul.f32 %v1022_v51, %v264_v55  ;;  %v1036_v61 = vmul.f32 %v1024_v52, %v265_v56 }
  0xce   : > { %v298_v7 = vmul.f32 %v296_v62, %v994_v27  ;;  %v299_v8 = vmul.f32 %v296_v62, %v996_v28  ;;  %v300_v9 = vmul.f32 %v296_v62, %v998_v29  ;;  %v301_v10 = vmul.f32 %v296_v62, %v1000_v30 }
  0xcf   : > { %v350_v3 = vsub.f32 1.0, %v1027_v58  ;;  %v351_v4 = vsub.f32 1.0, %v1030_v59  ;;  %v352_v5 = vsub.f32 1.0, %v1033_v60  ;;  %v353_v6 = vsub.f32 1.0, %v1036_v61 }
  0xd0   : > { %v310_v11 = vmul.f32 %v308_v57, %v986_v23  ;;  %v311_v12 = vmul.f32 %v308_v57, %v988_v24  ;;  %v312_v13 = vmul.f32 %v308_v57, %v990_v25  ;;  %v313_v14 = vmul.f32 %v308_v57, %v992_v26 }
  0xd1   : > { %v316_v15 = vpop.permute.xlu1 %315  ;;  %v302_v16 = vsub.f32 %v290_v63, %v298_v7  ;;  %v303_v17 = vsub.f32 %v291_v0, %v299_v8  ;;  %v304_v18 = vsub.f32 %v292_v1, %v300_v9  ;;  %v305_v19 = vsub.f32 %v293_v2, %v301_v10  ;;  %v328_v1 = vpop.permute.xlu0 %327 }
  0xd2   : > { %v318_v20 = vmul.f32 %v316_v15, %v994_v27  ;;  %v319_v21 = vmul.f32 %v316_v15, %v996_v28  ;;  %v320_v22 = vmul.f32 %v316_v15, %v998_v29  ;;  %v321_v31 = vmul.f32 %v316_v15, %v1000_v30 }
  0xd3   : > { %v354_v32 = vmul.f32 %v350_v3, %v302_v16  ;;  %v355_v33 = vmul.f32 %v351_v4, %v303_v17  ;;  %v356_v34 = vmul.f32 %v352_v5, %v304_v18  ;;  %v357_v35 = vmul.f32 %v353_v6, %v305_v19 }
  0xd4   : > { %v362_v36 = vmul.f32 %v302_v16, %v1018_v49  ;;  %v363_v37 = vmul.f32 %v303_v17, %v1020_v50  ;;  %v364_v38 = vmul.f32 %v304_v18, %v1022_v51  ;;  %v365_v39 = vmul.f32 %v305_v19, %v1024_v52 }
  0xd5   : > { %v322_v40 = vsub.f32 %v310_v11, %v318_v20  ;;  %v323_v41 = vsub.f32 %v311_v12, %v319_v21  ;;  %v324_v42 = vsub.f32 %v312_v13, %v320_v22  ;;  %v325_v43 = vsub.f32 %v313_v14, %v321_v31 }
  0xd6   : > { %v366_v44 = vsub.f32 1.0, %v362_v36  ;;  %v367_v45 = vsub.f32 1.0, %v363_v37  ;;  %v368_v46 = vsub.f32 1.0, %v364_v38  ;;  %v369_v47 = vsub.f32 1.0, %v365_v39  ;;  %v336_v60 = vpop.permute.xlu1 %335 }
  0xd7   : > { %v358_v48 = vadd.f32 %v354_v32, %v262_v53  ;;  %v359_v57 = vadd.f32 %v355_v33, %v263_v54  ;;  %v360_v58 = vadd.f32 %v356_v34, %v264_v55  ;;  %v361_v59 = vadd.f32 %v357_v35, %v265_v56 }
  0xd8   : > { %v378_v61 = vmul.f32 %v366_v44, %v322_v40  ;;  %v379_v62 = vmul.f32 %v367_v45, %v323_v41  ;;  %v380_v63 = vmul.f32 %v368_v46, %v324_v42  ;;  %v381_v0 = vmul.f32 %v369_v47, %v325_v43 }
  0xd9   : > { %v370_v2 = vmul.f32 %v358_v48, %v322_v40  ;;  %v371_v7 = vmul.f32 %v359_v57, %v323_v41  ;;  %v372_v8 = vmul.f32 %v360_v58, %v324_v42  ;;  %v373_v9 = vmul.f32 %v361_v59, %v325_v43 }
  0xda   : > { %v338_v10 = vmul.f32 %v336_v60, %v994_v27  ;;  %v339_v11 = vmul.f32 %v336_v60, %v996_v28  ;;  %v340_v12 = vmul.f32 %v336_v60, %v998_v29  ;;  %v341_v53 = vmul.f32 %v336_v60, %v1000_v30 }
  0xdb   : > { %v330_v54 = vmul.f32 %v328_v1, %v986_v23  ;;  %v331_v55 = vmul.f32 %v328_v1, %v988_v24  ;;  %v332_v56 = vmul.f32 %v328_v1, %v990_v25  ;;  %v333_v13 = vmul.f32 %v328_v1, %v992_v26 }
  0xdc   : > { %v374_v14 = vsub.f32 %v350_v3, %v370_v2  ;;  %v375_v15 = vsub.f32 %v351_v4, %v371_v7  ;;  %v376_v16 = vsub.f32 %v352_v5, %v372_v8  ;;  %v377_v17 = vsub.f32 %v353_v6, %v373_v9 }
  0xdd   : > { %v342_v18 = vsub.f32 %v330_v54, %v338_v10  ;;  %v343_v27 = vsub.f32 %v331_v55, %v339_v11  ;;  %v344_v19 = vsub.f32 %v332_v56, %v340_v12  ;;  %v345_v28 = vsub.f32 %v333_v13, %v341_v53 }
  0xde   : > { %v382_v29 = vadd.f32 %v378_v61, %v1018_v49  ;;  %v383_v30 = vadd.f32 %v379_v62, %v1020_v50  ;;  %v384_v23 = vadd.f32 %v380_v63, %v1022_v51  ;;  %v385_v24 = vadd.f32 %v381_v0, %v1024_v52 }
  0xdf   : > { %v386_v20 = vmul.f32 %v374_v14, %v342_v18  ;;  %v387_v25 = vmul.f32 %v375_v15, %v343_v27  ;;  %v388_v21 = vmul.f32 %v376_v16, %v344_v19  ;;  %v389_v26 = vmul.f32 %v377_v17, %v345_v28 }
  0xe0   : > { %v394_v3 = vmul.f32 %v382_v29, %v342_v18  ;;  %v395_v4 = vmul.f32 %v383_v30, %v343_v27  ;;  %v396_v5 = vmul.f32 %v384_v23, %v344_v19  ;;  %v397_v6 = vmul.f32 %v385_v24, %v345_v28 }
  0xe1   : > { %v390_v22 = vadd.f32 %v386_v20, %v358_v48  ;;  %v391_v31 = vadd.f32 %v387_v25, %v359_v57  ;;  %v392_v32 = vadd.f32 %v388_v21, %v360_v58  ;;  %v393_v33 = vadd.f32 %v389_v26, %v361_v59 }
  0xe2   : > { %v398_v34 = vsub.f32 %v366_v44, %v394_v3  ;;  %v399_v49 = vsub.f32 %v367_v45, %v395_v4  ;;  %v400_v35 = vsub.f32 %v368_v46, %v396_v5  ;;  %v401_v50 = vsub.f32 %v369_v47, %v397_v6 }
  0xe3   : > { %v406_v36 = vmul.f32 0.02, %v390_v22  ;;  %v407_v51 = vmul.f32 0.02, %v391_v31  ;;  %v408_v37 = vmul.f32 0.02, %v392_v32 }
  0xe4   : > { %v402_v52 = vadd.f32 %v398_v34, %v374_v14  ;;  %v403_v38 = vadd.f32 %v399_v49, %v375_v15  ;;  %v404_v39 = vadd.f32 %v400_v35, %v376_v16  ;;  %v409_v40 = vmul.f32 0.02, %v393_v33 }
  0xe5   : > { %v410_v41 = vmul.f32 50.0, %v382_v29  ;;  %v411_v42 = vmul.f32 50.0, %v383_v30  ;;  %v412_v43 = vmul.f32 50.0, %v384_v23  ;;  %v405_v60 = vadd.f32 %v401_v50, %v377_v17 }
  0xe6   : > { %v413_v61 = vmul.f32 50.0, %v385_v24  ;;  %v418_v44 = vmul.f32 %v402_v52, %v402_v52  ;;  %v419_v45 = vmul.f32 %v403_v38, %v403_v38  ;;  %v420_v46 = vmul.f32 %v404_v39, %v404_v39 }
  0xe7   : > { %v414_v48 = vadd.f32 %v410_v41, %v406_v36  ;;  %v415_v57 = vadd.f32 %v411_v42, %v407_v51  ;;  %v416_v58 = vadd.f32 %v412_v43, %v408_v37  ;;  %v421_v0 = vmul.f32 %v405_v60, %v405_v60 }
  0xe8   : > { %v417_v59 = vadd.f32 %v413_v61, %v409_v40 }
  0xe9   : > { %v422_v47 = vmul.f32 %v414_v48, %v414_v48  ;;  %v423_v62 = vmul.f32 %v415_v57, %v415_v57  ;;  %v424_v63 = vmul.f32 %v416_v58, %v416_v58 }
  0xea   : > { %v425_v1 = vmul.f32 %v417_v59, %v417_v59 }
  0xeb   : > { %v426_v2 = vadd.f32 %v422_v47, %v418_v44  ;;  %v427_v7 = vadd.f32 %v423_v62, %v419_v45  ;;  %v428_v8 = vadd.f32 %v424_v63, %v420_v46 }
  0xec   : > { %v429_v9 = vadd.f32 %v425_v1, %v421_v0 }
  0xed   : > { %686 = vlog2.f32 %v426_v2 }
  0xee   : > { %688 = vlog2.f32 %v427_v7 }
  0xef   : > { %690 = vlog2.f32 %v428_v8 }
  0xf0   : > { %692 = vlog2.f32 %v429_v9 }
  0xfa   : > { %v687_v10 = vpop.eup %686 }
  0xfb   : > { %v689_v11 = vpop.eup %688  ;;  %v431_v12 = vmul.f32 0.6931472, %v687_v10 }
  0xfc   : > { %v691_v53 = vpop.eup %690  ;;  %v433_v54 = vmul.f32 0.6931472, %v689_v11 }
  0xfd   : > { %v693_v55 = vpop.eup %692  ;;  %v435_v56 = vmul.f32 0.6931472, %v691_v53  ;;  %v438_v13 = vmul.f32 0.4342945, %v431_v12 }
  0xfe   : > { %v437_v14 = vmul.f32 0.6931472, %v693_v55  ;;  %v439_v15 = vmul.f32 0.4342945, %v433_v54 }
  0xff   : > { %v440_v16 = vmul.f32 0.4342945, %v435_v56  ;;  %v442_v17 = vmul.f32 10.0, %v438_v13 }
 0x100   : > { %v441_v18 = vmul.f32 0.4342945, %v437_v14  ;;  %v443_v27 = vmul.f32 10.0, %v439_v15 }
 0x101   : > { %v444_v19 = vmul.f32 10.0, %v440_v16  ;;  %v446_v28 = vsub.f32 6.0206, %v442_v17 }
 0x102   : > { %v445_v29 = vmul.f32 10.0, %v441_v18  ;;  %v447_v30 = vsub.f32 6.0206, %v443_v27 }
 0x103   : > { %v448_v23 = vsub.f32 6.0206, %v444_v19  ;;  %453 = vst [vmem:[%s193_s21] sm:$0xff] %v446_v28 }
 0x104   : > { %v449_v24 = vsub.f32 6.0206, %v445_v29  ;;  %454 = vst [vmem:[%s193_s21 + $0x8] sm:$0xff] %v447_v30 }
 0x105   : > { %455 = vst [vmem:[%s193_s21 + $0x10] sm:$0xff] %v448_v23 }
 0x106   : > { %456 = vst [vmem:[%s193_s21 + $0x18] sm:$0xff] %v449_v24 }
 0x107   : > { %761 = shalt.err (!%p758_p3)
}
 0x108   : > { %s762_s26 = scalar_lea.hbm %s1079_s22, 512  ;;  %s766_s30 = scalar_lea.hbm %s1123_s2, 1024 }
 0x109   : > { %p763_p5 = scmp.ne.s32.totalorder %s1079_s22, %s762_s26  ;;  %p767_p4 = scmp.lt.s32.totalorder %s1079_s22, %s1123_s2 }
 0x10a   : > { %p768_p10 = scmp.lt.s32.totalorder %s766_s30, %s762_s26 }
 0x10b   : > { %p764_p7 = pnand %p763_p5, %p948_p0 }
 0x10c   : > { %p769_p9 = por %p768_p10, %p767_p4 }
 0x10d   : > { %p765_p6 = pneg %p764_p7 }
 0x10f   : > { %p770_p1 = pnand %p769_p9, %p765_p6 }
 0x111   : > { %773 = shalt.err (!%p770_p1)
}
 0x112   : > { %594 = dma.vmem_to_hbm [thread:$0]  (%p948_p0), %s475_s8, 512, %s1079_s22, %s458_s23  }
 0x113 PF: > { %s486_s7 = sand.u32 1, %s812_s9   ;;  %p1134_p8 = scmp.ne.s32.totalorder %s1128_s20, 0 }
 0x114   : > { %p1135_p13 = scmp.ge.s32.totalorder %s832_s14, 2  ;;  %s487_s17 = scalar_lea.sflag [#allocation4], %s486_s7 }
 0x116   : > { %p605_p11 = pnand %p1135_p13, %p1134_p8 }
 0x118   : > { %p606_p2 = pneg %p605_p11 }
 0x11a   : > { %807 = dma.done.wait (%p606_p2), %s487_s17, 512  }
 0x11b   : > { %809 = vsyncadd (%p606_p2), %s487_s17, 4294966784  ;;  %s19_s14 = sadd.s32 1, %s832_s14   ;;  %s1136_s9 = smov %s816_s10 }
 0x11c   : > { %p16_p12 = scmp.ge.s32.totalorder %s19_s14, 4   ;;  %s1137_s10 = smov %s820_s11 }
 0x11d   : > { %s1138_s11 = smov %s954_s5  ;;  %s1139_s12 = smov %s828_s13 }
 0x11e   : > { %s1140_s13 = smov %s1142_s25  ;;  %18 = sbr.rel (!%p16_p12) target bundleno = 7 (0x7), region = 80 }
 0x123   :  { %492 = vsyncpa [#allocation3], 1 }
 0x124   :  { %494 = vsyncpa [#allocation3 + $0x1], 1 }
 0x125   :  { %495 = vsyncpa [#allocation6], 1 }
 0x126   :  { %497 = vsyncpa [#allocation6 + $0x1], 1 }
 0x127   :  { %498 = vsyncpa [#allocation4], 1 }
 0x128   :  { %500 = vsyncpa [#allocation4 + $0x1], 1 }

</bundles_post_ra>
